<compile_context>
chip_gen: v6e
topology: v6e:2x2x1
jax: 0.10.0
libtpu: 0.0.40
codegen_flags: <defaults>
</compile_context>

<pallas_src>
import functools

import jax
import jax.numpy as jnp
from jax.experimental import pallas as pl
from jax.experimental.pallas import tpu as pltpu

_MIB = 1024 * 1024
_NEG_INF = -1e30


# --------------------------------- sizing helpers ------------------------------------


def _device_kind():
    try:
        return jax.devices()[0].device_kind.lower()
    except Exception:
        return ""


def _row_tile_target():
    # v5e/v6e have 128 MiB VMEM -> bigger row tiles amortize the ~0.35us/grid-step
    # overhead and weight reuse; v7x has 64 MiB -> keep 256 so single-buffered resident
    # weights + double-buffered row blocks still fit.
    kind = _device_kind()
    if "v5" in kind or "v6" in kind:
        return 512
    return 256


def _vmem_cap_bytes():
    kind = _device_kind()
    if "v5" in kind or "v6" in kind:
        return 100 * _MIB     # 128 MiB physical
    return 60 * _MIB          # v7x: 64 MiB physical


def _vmem_limit(estimate_bytes):
    return int(min(max(estimate_bytes * 1.3, 32 * _MIB), _vmem_cap_bytes()))


def _round_up(n, m):
    return ((n + m - 1) // m) * m


def _row_tiling(n):
    """Row tile (multiple of 8) and padded row count so the grid always divides."""
    target = _row_tile_target()
    tn = min(target, _round_up(n, 8))
    return tn, _round_up(n, tn)


def _pad_rows(a, n_padded):
    pad = n_padded - a.shape[0]
    return a if pad == 0 else jnp.pad(a, ((0, pad), (0, 0)))


# ----------------------- Kernel A: LN1 + fused QKV projection -----------------------


def _ln_qkv_kernel(x_ref, pos_ref, g_ref, b_ref, wqk_ref, bqk_ref, wv_ref, bv_ref,
                   qk_ref, v_ref, *, compute_dtype):
    x = x_ref[...].astype(jnp.float32)
    mu = jnp.mean(x, axis=-1, keepdims=True)
    xc = x - mu
    var = jnp.mean(xc * xc, axis=-1, keepdims=True)
    xn = xc * jax.lax.rsqrt(var + 1e-5) * g_ref[...].astype(jnp.float32) \
        + b_ref[...].astype(jnp.float32)

    qk_in = (xn + pos_ref[...].astype(jnp.float32)).astype(compute_dtype)
    v_in = xn.astype(compute_dtype)

    # Q and K share the same input -> one wide (E, 2E) MXU matmul, lane-dense store.
    qk = jnp.dot(qk_in, wqk_ref[...], preferred_element_type=jnp.float32)
    qk = qk + bqk_ref[...].astype(jnp.float32)
    v = jnp.dot(v_in, wv_ref[...], preferred_element_type=jnp.float32)
    v = v + bv_ref[...].astype(jnp.float32)

    qk_ref[...] = qk.astype(qk_ref.dtype)
    v_ref[...] = v.astype(v_ref.dtype)


def ln_qkv(x2d, pos2d, p, compute_dtype):
    N, E = x2d.shape
    tn, Np = _row_tiling(N)
    x2d = _pad_rows(x2d, Np)
    pos2d = _pad_rows(pos2d, Np)

    cd = jnp.dtype(compute_dtype).itemsize
    w_bytes = (E * 2 * E + E * E) * cd + (2 * E + E) * 4 + 2 * E * 4
    stream_bytes = 2 * tn * (2 * E * 4 + 3 * E * cd)
    cost = pl.CostEstimate(
        flops=int(2 * Np * E * 3 * E),
        transcendentals=int(Np),
        bytes_accessed=int(2 * N * E * 4 + w_bytes + N * 3 * E * cd))

    # Constant-index weights: single-buffered (halves their VMEM footprint).
    resident = functools.partial(pl.BlockSpec, index_map=lambda i: (0, 0),
                                 pipeline_mode=pl.Buffered(1))
    kern = functools.partial(_ln_qkv_kernel, compute_dtype=compute_dtype)
    qk2, v2 = pl.pallas_call(
        kern,
        out_shape=(jax.ShapeDtypeStruct((Np, 2 * E), compute_dtype),
                   jax.ShapeDtypeStruct((Np, E), compute_dtype)),
        grid=(Np // tn,),
        in_specs=[
            pl.BlockSpec((tn, E), lambda i: (i, 0)),      # x rows
            pl.BlockSpec((tn, E), lambda i: (i, 0)),      # position rows
            resident((1, E)),                             # ln1 gamma
            resident((1, E)),                             # ln1 beta
            resident((E, 2 * E)),                         # [Wq*scale | Wk]
            resident((1, 2 * E)),                         # [bq*scale | bk]
            resident((E, E)),                             # Wv
            resident((1, E)),                             # bv
        ],
        out_specs=(pl.BlockSpec((tn, 2 * E), lambda i: (i, 0)),
                   pl.BlockSpec((tn, E), lambda i: (i, 0))),
        compiler_params=pltpu.CompilerParams(
            dimension_semantics=("parallel",),
            vmem_limit_bytes=_vmem_limit(w_bytes + stream_bytes)),
        cost_estimate=cost,
    )(x2d, pos2d, p["ln1_g"], p["ln1_b"], p["wqk"], p["bqk"], p["wv"], p["bv"])
    return qk2[:N], v2[:N]


# -------------------- Kernel B: flash attention (causal, per batch*head) -------------


def _flash_attn_kernel(q_ref, k_ref, v_ref, o_ref, m_sc, l_sc, acc_sc, *, tq, tk):
    qi = pl.program_id(1)
    ki = pl.program_id(2)

    @pl.when(ki == 0)
    def _():
        m_sc[...] = jnp.full_like(m_sc, _NEG_INF)
        l_sc[...] = jnp.zeros_like(l_sc)
        acc_sc[...] = jnp.zeros_like(acc_sc)

    q_start = qi * tq
    k_start = ki * tk

    # Causal tile skipping: KV tiles entirely above the diagonal contribute nothing.
    @pl.when(k_start <= q_start + tq - 1)
    def _():
        q = q_ref[0]                                      # (tq, hd), compute dtype
        k = k_ref[0]                                      # (tk, hd)
        v = v_ref[0]                                      # (tk, hd)
        s = jax.lax.dot_general(q, k, (((1,), (1,)), ((), ())),
                                preferred_element_type=jnp.float32)   # (tq, tk)
        # In-kernel causal mask (VPU filler, hides under MXU slack).
        row = q_start + jax.lax.broadcasted_iota(jnp.int32, (tq, tk), 0)
        col = k_start + jax.lax.broadcasted_iota(jnp.int32, (tq, tk), 1)
        s = jnp.where(col <= row, s, _NEG_INF)

        m_prev = m_sc[...]
        m_new = jnp.maximum(m_prev, jnp.max(s, axis=-1, keepdims=True))
        alpha = jnp.exp(m_prev - m_new)
        p = jnp.exp(s - m_new)
        l_sc[...] = alpha * l_sc[...] + jnp.sum(p, axis=-1, keepdims=True)
        acc_sc[...] = alpha * acc_sc[...] + jnp.dot(
            p.astype(v.dtype), v, preferred_element_type=jnp.float32)
        m_sc[...] = m_new

    @pl.when(ki == pl.num_programs(2) - 1)
    def _():
        # exact reciprocal for tight parity with the reference softmax
        o_ref[0] = (acc_sc[...] *
                    pl.reciprocal(l_sc[...], approx=False)).astype(o_ref.dtype)


def flash_attention(q, k, v):
    """q, k, v: (B*H, T, hd) head-major. Causal mask generated in-kernel."""
    BH, T, hd = q.shape
    t = min(128, _round_up(T, 8))
    Tp = _round_up(T, t)
    if Tp != T:
        pad = ((0, 0), (0, Tp - T), (0, 0))
        q, k, v = jnp.pad(q, pad), jnp.pad(k, pad), jnp.pad(v, pad)
    nq = Tp // t

    cd = jnp.dtype(q.dtype).itemsize
    cost = pl.CostEstimate(
        flops=int(4 * BH * Tp * Tp * hd),
        transcendentals=int(BH * Tp * Tp),
        bytes_accessed=int(4 * BH * Tp * hd * cd))
    kern = functools.partial(_flash_attn_kernel, tq=t, tk=t)
    out = pl.pallas_call(
        kern,
        out_shape=jax.ShapeDtypeStruct((BH, Tp, hd), q.dtype),
        grid=(BH, nq, nq),
        in_specs=[
            pl.BlockSpec((1, t, hd), lambda b, i, j: (b, i, 0)),
            pl.BlockSpec((1, t, hd), lambda b, i, j: (b, j, 0)),
            pl.BlockSpec((1, t, hd), lambda b, i, j: (b, j, 0)),
        ],
        out_specs=pl.BlockSpec((1, t, hd), lambda b, i, j: (b, i, 0)),
        scratch_shapes=[pltpu.VMEM((t, 1), jnp.float32),      # m (running max)
                        pltpu.VMEM((t, 1), jnp.float32),      # l (running denom)
                        pltpu.VMEM((t, hd), jnp.float32)],    # acc
        compiler_params=pltpu.CompilerParams(
            dimension_semantics=("parallel", "parallel", "arbitrary"),
            vmem_limit_bytes=_vmem_limit(8 * t * hd * cd + t * (hd + 2) * 4)),
        cost_estimate=cost,
    )(q, k, v)
    return out[:, :T, :]


# -------------- Kernel C: out-proj + residual + LN2 + FFN + residual -----------------


def _outproj_ffn_kernel(a_ref, res_ref, wo_ref, bo_ref, g_ref, b_ref,
                        w1_ref, b1_ref, w2_ref, b2_ref, o_ref, *, compute_dtype):
    a = jnp.dot(a_ref[...], wo_ref[...], preferred_element_type=jnp.float32)
    a = a + bo_ref[...].astype(jnp.float32)
    x1 = res_ref[...].astype(jnp.float32) + a

    mu = jnp.mean(x1, axis=-1, keepdims=True)
    xc = x1 - mu
    var = jnp.mean(xc * xc, axis=-1, keepdims=True)
    xn = xc * jax.lax.rsqrt(var + 1e-5) * g_ref[...].astype(jnp.float32) \
        + b_ref[...].astype(jnp.float32)

    h = jnp.dot(xn.astype(compute_dtype), w1_ref[...],
                preferred_element_type=jnp.float32)
    h = jnp.maximum(h + b1_ref[...].astype(jnp.float32), 0.0)
    y = jnp.dot(h.astype(compute_dtype), w2_ref[...],
                preferred_element_type=jnp.float32)
    y = y + b2_ref[...].astype(jnp.float32)
    o_ref[...] = (x1 + y).astype(o_ref.dtype)


def outproj_ffn(attn2d, resid2d, p, compute_dtype, out_dtype):
    N, E = attn2d.shape
    F = p["fc1_w"].shape[1]
    tn, Np = _row_tiling(N)
    attn2d = _pad_rows(attn2d, Np)
    resid2d = _pad_rows(resid2d, Np)

    cd = jnp.dtype(compute_dtype).itemsize
    od = jnp.dtype(out_dtype).itemsize
    w_bytes = (E * E + 2 * E * F) * cd + (5 * E + F) * 4
    stream_bytes = 2 * tn * (E * cd + E * 4 + E * od) + tn * F * 4
    cost = pl.CostEstimate(
        flops=int(2 * Np * (E * E + 2 * E * F)),
        transcendentals=int(Np),
        bytes_accessed=int(N * E * (cd + 4 + od) + w_bytes))

    resident = functools.partial(pl.BlockSpec, index_map=lambda i: (0, 0),
                                 pipeline_mode=pl.Buffered(1))
    kern = functools.partial(_outproj_ffn_kernel, compute_dtype=compute_dtype)
    out = pl.pallas_call(
        kern,
        out_shape=jax.ShapeDtypeStruct((Np, E), out_dtype),
        grid=(Np // tn,),
        in_specs=[
            pl.BlockSpec((tn, E), lambda i: (i, 0)),     # attention output rows
            pl.BlockSpec((tn, E), lambda i: (i, 0)),     # residual rows (pre-LN x)
            resident((E, E)),                            # Wo
            resident((1, E)),                            # bo
            resident((1, E)),                            # ln2 gamma
            resident((1, E)),                            # ln2 beta
            resident((E, F)),                            # W1
            resident((1, F)),                            # b1
            resident((F, E)),                            # W2
            resident((1, E)),                            # b2
        ],
        out_specs=pl.BlockSpec((tn, E), lambda i: (i, 0)),
        compiler_params=pltpu.CompilerParams(
            dimension_semantics=("parallel",),
            vmem_limit_bytes=_vmem_limit(w_bytes + stream_bytes)),
        cost_estimate=cost,
    )(attn2d, resid2d, p["o_w"], p["o_b"], p["ln2_g"], p["ln2_b"],
      p["fc1_w"], p["fc1_b"], p["fc2_w"], p["fc2_b"])
    return out[:N]


# ------------------------------ params + forward ------------------------------------


def init_params(key, embed_dim, ffn_dim):
    ks = jax.random.split(key, 8)
    s = 0.02

    def w(k, shape):
        return (s * jax.random.normal(k, shape)).astype(jnp.float32)

    E, F = embed_dim, ffn_dim
    return {
        "q_w": w(ks[0], (E, E)), "q_b": jnp.zeros((E,), jnp.float32),
        "k_w": w(ks[1], (E, E)), "k_b": jnp.zeros((E,), jnp.float32),
        "v_w": w(ks[2], (E, E)), "v_b": jnp.zeros((E,), jnp.float32),
        "o_w": w(ks[3], (E, E)), "o_b": jnp.zeros((E,), jnp.float32),
        "ln1_g": jnp.ones((E,), jnp.float32), "ln1_b": jnp.zeros((E,), jnp.float32),
        "ln2_g": jnp.ones((E,), jnp.float32), "ln2_b": jnp.zeros((E,), jnp.float32),
        "fc1_w": w(ks[4], (E, F)), "fc1_b": w(ks[5], (F,)),
        "fc2_w": w(ks[6], (F, E)), "fc2_b": w(ks[7], (E,)),
    }


def prepare_params(params, num_heads, compute_dtype=jnp.float32):
    """Fold the 1/sqrt(hd) query scale into Wq/bq, concatenate Q|K weights for one wide
    matmul, reshape biases/LN params to (1, dim), cast matmul weights to compute_dtype
    (biases/LN stay fp32)."""
    E = params["q_w"].shape[0]
    F = params["fc1_w"].shape[1]
    hd = E // num_heads
    scale = hd ** -0.5
    cd, f32 = compute_dtype, jnp.float32
    return {
        "wqk": jnp.concatenate([params["q_w"] * scale, params["k_w"]], axis=1).astype(cd),
        "bqk": jnp.concatenate([params["q_b"] * scale, params["k_b"]]).reshape(1, 2 * E).astype(f32),
        "wv": params["v_w"].astype(cd), "bv": params["v_b"].reshape(1, E).astype(f32),
        "o_w": params["o_w"].astype(cd), "o_b": params["o_b"].reshape(1, E).astype(f32),
        "ln1_g": params["ln1_g"].reshape(1, E).astype(f32),
        "ln1_b": params["ln1_b"].reshape(1, E).astype(f32),
        "ln2_g": params["ln2_g"].reshape(1, E).astype(f32),
        "ln2_b": params["ln2_b"].reshape(1, E).astype(f32),
        "fc1_w": params["fc1_w"].astype(cd), "fc1_b": params["fc1_b"].reshape(1, F).astype(f32),
        "fc2_w": params["fc2_w"].astype(cd), "fc2_b": params["fc2_b"].reshape(1, E).astype(f32),
    }


def decoder_layer_forward(prepared, x, positions, num_heads,
                          compute_dtype=jnp.float32):
    """x, positions: (T, B, E). Causal self-attention mask is generated inside the
    attention kernel. Returns (out (T,B,E), attn=None, None) like the PyTorch module.
    Pre-norm (decoder_normalize_before=True) ordering only."""
    T, B, E = x.shape
    H = num_heads
    hd = E // H
    N = T * B

    # rows stay in (T, B) order -> no transpose on the residual / output path
    x2d = x.reshape(N, E)
    pos2d = positions[:T].reshape(N, E)

    qk2, v2 = ln_qkv(x2d, pos2d, prepared, compute_dtype)          # (N, 2E), (N, E)

    # head-major (B*H, T, hd) so attention head slicing is done by the BlockSpec DMA
    # (lane-aligned), not by in-kernel lane slices.
    qk = qk2.reshape(T, B, 2, H, hd).transpose(2, 1, 3, 0, 4).reshape(2, B * H, T, hd)
    q, k = qk[0], qk[1]
    v = v2.reshape(T, B, H, hd).transpose(1, 2, 0, 3).reshape(B * H, T, hd)

    attn = flash_attention(q, k, v)                                # (B*H, T, hd)
    attn2d = attn.reshape(B, H, T, hd).transpose(2, 0, 1, 3).reshape(N, E)

    out2 = outproj_ffn(attn2d, x2d, prepared, compute_dtype, x.dtype)
    return out2.reshape(T, B, E), None, None


# ------------------------------ pure-JAX reference ----------------------------------


def reference_forward(params, x, positions, mask, num_heads):
    T, B, E = x.shape
    H, hd = num_heads, E // num_heads
    scale = hd ** -0.5

    def ln(t, g, b):
        mu = t.mean(-1, keepdims=True)
        var = ((t - mu) ** 2).mean(-1, keepdims=True)
        return (t - mu) / jnp.sqrt(var + 1e-5) * g + b

    residual = x
    xn = ln(x, params["ln1_g"], params["ln1_b"])
    q = (xn + positions[:T]) @ params["q_w"] + params["q_b"]
    k = (xn + positions[:T]) @ params["k_w"] + params["k_b"]
    v = xn @ params["v_w"] + params["v_b"]

    def sh(t):
        return t.reshape(T, B * H, hd).transpose(1, 0, 2)

    qh, kh, vh = sh(q), sh(k), sh(v)
    s = jnp.einsum("btd,bsd->bts", qh * scale, kh) + mask[None]
    p = jax.nn.softmax(s, axis=-1)
    a = jnp.einsum("bts,bsd->btd", p, vh).transpose(1, 0, 2).reshape(T, B, E)
    a = a @ params["o_w"] + params["o_b"]
    x1 = residual + a

    residual = x1
    xn2 = ln(x1, params["ln2_g"], params["ln2_b"])
    h = jax.nn.relu(xn2 @ params["fc1_w"] + params["fc1_b"])
    return residual + (h @ params["fc2_w"] + params["fc2_b"])


# ----------------------------------- main -------------------------------------------


if __name__ == "__main__":
    T, B, E, H, F = 8, 2, 32, 4, 64

    key = jax.random.PRNGKey(0)
    k_p, k_x, k_pos = jax.random.split(key, 3)
    params = init_params(k_p, E, F)

    x = jax.random.normal(k_x, (T, B, E), dtype=jnp.float32)
    positions = jax.random.normal(k_pos, (T, B, E), dtype=jnp.float32)
    # explicit causal mask only used by the pure-JAX reference; kernel builds it in-kernel
    causal_mask = jnp.triu(jnp.full((T, T), -1e9, dtype=jnp.float32), k=1)

    ref = reference_forward(params, x, positions, causal_mask, H)

    # fp32 matmul path: tight correctness check
    prep32 = prepare_params(params, H, jnp.float32)
    fwd32 = jax.jit(functools.partial(decoder_layer_forward, num_heads=H,
                                      compute_dtype=jnp.float32))
    out32, _, _ = fwd32(prep32, x, positions)
    out32 = jax.block_until_ready(out32)
    assert out32.shape == (T, B, E)
    assert jnp.allclose(out32, ref, atol=2e-3, rtol=2e-3), "fp32 mismatch vs reference"

    # bf16 matmul operands (fp32 accumulation): production-precision path, loose check
    prep16 = prepare_params(params, H, jnp.bfloat16)
    fwd16 = jax.jit(functools.partial(decoder_layer_forward, num_heads=H,
                                      compute_dtype=jnp.bfloat16))
    out16, _, _ = fwd16(prep16, x, positions)
    out16 = jax.block_until_ready(out16)
    assert out16.shape == (T, B, E)
    assert jnp.allclose(out16, ref, atol=5e-2, rtol=5e-2), "bf16 mismatch vs reference"

    print("KERNEL_OK")
</pallas_src>

<mosaic_0001>
module attributes {stable_mosaic.version = 11 : i64} {
  func.func @_ln_qkv_kernel(%arg0: i32, %arg1: memref<16x32xf32, #tpu.memory_space<vmem>>, %arg2: memref<16x32xf32, #tpu.memory_space<vmem>>, %arg3: memref<1x32xf32, #tpu.memory_space<vmem>>, %arg4: memref<1x32xf32, #tpu.memory_space<vmem>>, %arg5: memref<32x64xf32, #tpu.memory_space<vmem>>, %arg6: memref<1x64xf32, #tpu.memory_space<vmem>>, %arg7: memref<32x32xf32, #tpu.memory_space<vmem>>, %arg8: memref<1x32xf32, #tpu.memory_space<vmem>>, %arg9: memref<16x64xf32, #tpu.memory_space<vmem>>, %arg10: memref<16x32xf32, #tpu.memory_space<vmem>>) attributes {dimension_semantics = [#tpu.dimension_semantics<parallel>], iteration_bounds = array<i64: 1>, scalar_prefetch = 0 : i64, scratch_operands = 0 : i64, tpu.core_type = #tpu.core_type<tc>, window_params = [{transform_indices = @transform_0, window_bounds = array<i64: 16, 32>}, {transform_indices = @transform_1, window_bounds = array<i64: 16, 32>}, {pipeline_mode = #tpu.pipeline_mode<synchronous>, transform_indices = @transform_2, window_bounds = array<i64: 1, 32>}, {pipeline_mode = #tpu.pipeline_mode<synchronous>, transform_indices = @transform_3, window_bounds = array<i64: 1, 32>}, {pipeline_mode = #tpu.pipeline_mode<synchronous>, transform_indices = @transform_4, window_bounds = array<i64: 32, 64>}, {pipeline_mode = #tpu.pipeline_mode<synchronous>, transform_indices = @transform_5, window_bounds = array<i64: 1, 64>}, {pipeline_mode = #tpu.pipeline_mode<synchronous>, transform_indices = @transform_6, window_bounds = array<i64: 32, 32>}, {pipeline_mode = #tpu.pipeline_mode<synchronous>, transform_indices = @transform_7, window_bounds = array<i64: 1, 32>}, {transform_indices = @transform_8, window_bounds = array<i64: 16, 64>}, {transform_indices = @transform_9, window_bounds = array<i64: 16, 32>}]} {
    %c0 = arith.constant 0 : index
    %c0_0 = arith.constant 0 : index
    %0 = vector.load %arg1[%c0, %c0_0] : memref<16x32xf32, #tpu.memory_space<vmem>>, vector<16x32xf32>
    %cst = arith.constant dense<0.000000e+00> : vector<16xf32>
    %1 = vector.multi_reduction <add>, %0, %cst [1] : vector<16x32xf32> to vector<16xf32>
    %2 = vector.shape_cast %1 : vector<16xf32> to vector<16x1xf32>
    %cst_1 = arith.constant 3.200000e+01 : f32
    %3 = vector.broadcast %cst_1 : f32 to vector<16x1xf32>
    %4 = arith.divf %2, %3 : vector<16x1xf32>
    %5 = vector.broadcast %4 : vector<16x1xf32> to vector<16x32xf32>
    %6 = arith.subf %0, %5 : vector<16x32xf32>
    %7 = arith.mulf %6, %6 : vector<16x32xf32>
    %cst_2 = arith.constant dense<0.000000e+00> : vector<16xf32>
    %8 = vector.multi_reduction <add>, %7, %cst_2 [1] : vector<16x32xf32> to vector<16xf32>
    %9 = vector.shape_cast %8 : vector<16xf32> to vector<16x1xf32>
    %cst_3 = arith.constant 3.200000e+01 : f32
    %10 = vector.broadcast %cst_3 : f32 to vector<16x1xf32>
    %11 = arith.divf %9, %10 : vector<16x1xf32>
    %cst_4 = arith.constant 9.99999974E-6 : f32
    %12 = vector.broadcast %cst_4 : f32 to vector<16x1xf32>
    %13 = arith.addf %11, %12 : vector<16x1xf32>
    %14 = math.rsqrt %13 : vector<16x1xf32>
    %15 = vector.broadcast %14 : vector<16x1xf32> to vector<16x32xf32>
    %16 = arith.mulf %6, %15 : vector<16x32xf32>
    %c0_5 = arith.constant 0 : index
    %c0_6 = arith.constant 0 : index
    %17 = vector.load %arg3[%c0_5, %c0_6] : memref<1x32xf32, #tpu.memory_space<vmem>>, vector<1x32xf32>
    %18 = vector.broadcast %17 : vector<1x32xf32> to vector<16x32xf32>
    %19 = arith.mulf %16, %18 : vector<16x32xf32>
    %c0_7 = arith.constant 0 : index
    %c0_8 = arith.constant 0 : index
    %20 = vector.load %arg4[%c0_7, %c0_8] : memref<1x32xf32, #tpu.memory_space<vmem>>, vector<1x32xf32>
    %21 = vector.broadcast %20 : vector<1x32xf32> to vector<16x32xf32>
    %22 = arith.addf %19, %21 : vector<16x32xf32>
    %c0_9 = arith.constant 0 : index
    %c0_10 = arith.constant 0 : index
    %23 = vector.load %arg2[%c0_9, %c0_10] : memref<16x32xf32, #tpu.memory_space<vmem>>, vector<16x32xf32>
    %24 = arith.addf %22, %23 : vector<16x32xf32>
    %c0_11 = arith.constant 0 : index
    %c0_12 = arith.constant 0 : index
    %25 = vector.load %arg5[%c0_11, %c0_12] : memref<32x64xf32, #tpu.memory_space<vmem>>, vector<32x64xf32>
    %cst_13 = arith.constant dense<0.000000e+00> : vector<16x64xf32>
    %26 = tpu.matmul %24, %25, %cst_13 {dimension_numbers = #tpu.dot_dimension_numbers<[1], [0], [0], [1], [0, 0, 1, 1], [], []>} : vector<16x32xf32>, vector<32x64xf32>, vector<16x64xf32> -> vector<16x64xf32>
    %c0_14 = arith.constant 0 : index
    %c0_15 = arith.constant 0 : index
    %27 = vector.load %arg6[%c0_14, %c0_15] : memref<1x64xf32, #tpu.memory_space<vmem>>, vector<1x64xf32>
    %28 = vector.broadcast %27 : vector<1x64xf32> to vector<16x64xf32>
    %29 = arith.addf %26, %28 : vector<16x64xf32>
    %c0_16 = arith.constant 0 : index
    %c0_17 = arith.constant 0 : index
    %30 = vector.load %arg7[%c0_16, %c0_17] : memref<32x32xf32, #tpu.memory_space<vmem>>, vector<32x32xf32>
    %cst_18 = arith.constant dense<0.000000e+00> : vector<16x32xf32>
    %31 = tpu.matmul %22, %30, %cst_18 {dimension_numbers = #tpu.dot_dimension_numbers<[1], [0], [0], [1], [0, 0, 1, 1], [], []>} : vector<16x32xf32>, vector<32x32xf32>, vector<16x32xf32> -> vector<16x32xf32>
    %c0_19 = arith.constant 0 : index
    %c0_20 = arith.constant 0 : index
    %32 = vector.load %arg8[%c0_19, %c0_20] : memref<1x32xf32, #tpu.memory_space<vmem>>, vector<1x32xf32>
    %33 = vector.broadcast %32 : vector<1x32xf32> to vector<16x32xf32>
    %34 = arith.addf %31, %33 : vector<16x32xf32>
    %c0_21 = arith.constant 0 : index
    %c0_22 = arith.constant 0 : index
    %35 = vector.load %arg9[%c0_21, %c0_22] : memref<16x64xf32, #tpu.memory_space<vmem>>, vector<16x64xf32>
    tpu.vector_store %arg9[%c0_21, %c0_22], %29 {strides = array<i32>} : memref<16x64xf32, #tpu.memory_space<vmem>>, vector<16x64xf32>,
    %c0_23 = arith.constant 0 : index
    %c0_24 = arith.constant 0 : index
    %36 = vector.load %arg10[%c0_23, %c0_24] : memref<16x32xf32, #tpu.memory_space<vmem>>, vector<16x32xf32>
    tpu.vector_store %arg10[%c0_23, %c0_24], %34 {strides = array<i32>} : memref<16x32xf32, #tpu.memory_space<vmem>>, vector<16x32xf32>,
    return
  }
  func.func @transform_0(%arg0: i32) -> (i32, i32) {
    %c0_i32 = arith.constant 0 : i32
    %c0_i32_0 = arith.constant 0 : i32
    return %arg0, %c0_i32 : i32, i32
  }
  func.func @transform_1(%arg0: i32) -> (i32, i32) {
    %c0_i32 = arith.constant 0 : i32
    %c0_i32_0 = arith.constant 0 : i32
    return %arg0, %c0_i32 : i32, i32
  }
  func.func @transform_2(%arg0: i32) -> (i32, i32) {
    %c0_i32 = arith.constant 0 : i32
    %c0_i32_0 = arith.constant 0 : i32
    %c0_i32_1 = arith.constant 0 : i32
    return %c0_i32, %c0_i32_0 : i32, i32
  }
  func.func @transform_3(%arg0: i32) -> (i32, i32) {
    %c0_i32 = arith.constant 0 : i32
    %c0_i32_0 = arith.constant 0 : i32
    %c0_i32_1 = arith.constant 0 : i32
    return %c0_i32, %c0_i32_0 : i32, i32
  }
  func.func @transform_4(%arg0: i32) -> (i32, i32) {
    %c0_i32 = arith.constant 0 : i32
    %c0_i32_0 = arith.constant 0 : i32
    %c0_i32_1 = arith.constant 0 : i32
    return %c0_i32, %c0_i32_0 : i32, i32
  }
  func.func @transform_5(%arg0: i32) -> (i32, i32) {
    %c0_i32 = arith.constant 0 : i32
    %c0_i32_0 = arith.constant 0 : i32
    %c0_i32_1 = arith.constant 0 : i32
    return %c0_i32, %c0_i32_0 : i32, i32
  }
  func.func @transform_6(%arg0: i32) -> (i32, i32) {
    %c0_i32 = arith.constant 0 : i32
    %c0_i32_0 = arith.constant 0 : i32
    %c0_i32_1 = arith.constant 0 : i32
    return %c0_i32, %c0_i32_0 : i32, i32
  }
  func.func @transform_7(%arg0: i32) -> (i32, i32) {
    %c0_i32 = arith.constant 0 : i32
    %c0_i32_0 = arith.constant 0 : i32
    %c0_i32_1 = arith.constant 0 : i32
    return %c0_i32, %c0_i32_0 : i32, i32
  }
  func.func @transform_8(%arg0: i32) -> (i32, i32) {
    %c0_i32 = arith.constant 0 : i32
    %c0_i32_0 = arith.constant 0 : i32
    return %arg0, %c0_i32 : i32, i32
  }
  func.func @transform_9(%arg0: i32) -> (i32, i32) {
    %c0_i32 = arith.constant 0 : i32
    %c0_i32_0 = arith.constant 0 : i32
    return %arg0, %c0_i32 : i32, i32
  }
}

module attributes {stable_mosaic.version = 11 : i64} {
  func.func @_flash_attn_kernel(%arg0: i32, %arg1: i32, %arg2: i32, %arg3: memref<1x8x8xf32, #tpu.memory_space<vmem>>, %arg4: memref<1x8x8xf32, #tpu.memory_space<vmem>>, %arg5: memref<1x8x8xf32, #tpu.memory_space<vmem>>, %arg6: memref<1x8x8xf32, #tpu.memory_space<vmem>>, %arg7: memref<8x1xf32, #tpu.memory_space<vmem>>, %arg8: memref<8x1xf32, #tpu.memory_space<vmem>>, %arg9: memref<8x8xf32, #tpu.memory_space<vmem>>) attributes {dimension_semantics = [#tpu.dimension_semantics<parallel>, #tpu.dimension_semantics<parallel>, #tpu.dimension_semantics<arbitrary>], iteration_bounds = array<i64: 8, 1, 1>, scalar_prefetch = 0 : i64, scratch_operands = 3 : i64, tpu.core_type = #tpu.core_type<tc>, window_params = [{transform_indices = @transform_0, window_bounds = array<i64: 1, 8, 8>}, {transform_indices = @transform_1, window_bounds = array<i64: 1, 8, 8>}, {transform_indices = @transform_2, window_bounds = array<i64: 1, 8, 8>}, {transform_indices = @transform_3, window_bounds = array<i64: 1, 8, 8>}]} {
    %c0_i32 = arith.constant 0 : i32
    %0 = arith.cmpi eq, %arg2, %c0_i32 : i32
    %1 = arith.extui %0 : i1 to i32
    %c0_i32_0 = arith.constant 0 : i32
    %2 = arith.cmpi ne, %1, %c0_i32_0 : i32
    scf.if %2 {
      %cst = arith.constant -1.000000e+30 : f32
      %13 = vector.broadcast %cst : f32 to vector<8x1xf32>
      %c0 = arith.constant 0 : index
      %c0_6 = arith.constant 0 : index
      %14 = vector.load %arg7[%c0, %c0_6] : memref<8x1xf32, #tpu.memory_space<vmem>>, vector<8x1xf32>
      tpu.vector_store %arg7[%c0, %c0_6], %13 {strides = array<i32>} : memref<8x1xf32, #tpu.memory_space<vmem>>, vector<8x1xf32>,
      %cst_7 = arith.constant 0.000000e+00 : f32
      %15 = vector.broadcast %cst_7 : f32 to vector<8x1xf32>
      %c0_8 = arith.constant 0 : index
      %c0_9 = arith.constant 0 : index
      %16 = vector.load %arg8[%c0_8, %c0_9] : memref<8x1xf32, #tpu.memory_space<vmem>>, vector<8x1xf32>
      tpu.vector_store %arg8[%c0_8, %c0_9], %15 {strides = array<i32>} : memref<8x1xf32, #tpu.memory_space<vmem>>, vector<8x1xf32>,
      %cst_10 = arith.constant 0.000000e+00 : f32
      %17 = vector.broadcast %cst_10 : f32 to vector<8x8xf32>
      %c0_11 = arith.constant 0 : index
      %c0_12 = arith.constant 0 : index
      %18 = vector.load %arg9[%c0_11, %c0_12] : memref<8x8xf32, #tpu.memory_space<vmem>>, vector<8x8xf32>
      tpu.vector_store %arg9[%c0_11, %c0_12], %17 {strides = array<i32>} : memref<8x8xf32, #tpu.memory_space<vmem>>, vector<8x8xf32>,
    } else {
    }
    %c8_i32 = arith.constant 8 : i32
    %3 = arith.muli %arg1, %c8_i32 : i32
    %c8_i32_1 = arith.constant 8 : i32
    %4 = arith.muli %arg2, %c8_i32_1 : i32
    %c8_i32_2 = arith.constant 8 : i32
    %5 = arith.addi %3, %c8_i32_2 : i32
    %c1_i32 = arith.constant 1 : i32
    %6 = arith.subi %5, %c1_i32 : i32
    %7 = arith.cmpi sle, %4, %6 : i32
    %8 = arith.extui %7 : i1 to i32
    %c0_i32_3 = arith.constant 0 : i32
    %9 = arith.cmpi ne, %8, %c0_i32_3 : i32
    scf.if %9 {
      %c0 = arith.constant 0 : index
      %c0_6 = arith.constant 0 : index
      %c0_7 = arith.constant 0 : index
      %13 = vector.load %arg3[%c0, %c0_6, %c0_7] : memref<1x8x8xf32, #tpu.memory_space<vmem>>, vector<1x8x8xf32>
      %14 = vector.shape_cast %13 : vector<1x8x8xf32> to vector<8x8xf32>
      %c0_8 = arith.constant 0 : index
      %c0_9 = arith.constant 0 : index
      %c0_10 = arith.constant 0 : index
      %15 = vector.load %arg4[%c0_8, %c0_9, %c0_10] : memref<1x8x8xf32, #tpu.memory_space<vmem>>, vector<1x8x8xf32>
      %16 = vector.shape_cast %15 : vector<1x8x8xf32> to vector<8x8xf32>
      %c0_11 = arith.constant 0 : index
      %c0_12 = arith.constant 0 : index
      %c0_13 = arith.constant 0 : index
      %17 = vector.load %arg5[%c0_11, %c0_12, %c0_13] : memref<1x8x8xf32, #tpu.memory_space<vmem>>, vector<1x8x8xf32>
      %18 = vector.shape_cast %17 : vector<1x8x8xf32> to vector<8x8xf32>
      %cst = arith.constant dense<0.000000e+00> : vector<8x8xf32>
      %19 = tpu.matmul %14, %16, %cst {dimension_numbers = #tpu.dot_dimension_numbers<[1], [1], [0], [0], [0, 0, 1, 0], [], []>} : vector<8x8xf32>, vector<8x8xf32>, vector<8x8xf32> -> vector<8x8xf32>
      %20 = tpu.iota {dimensions = array<i32: 0>} : vector<8x8xi32>
      %21 = vector.broadcast %3 : i32 to vector<8x8xi32>
      %22 = arith.addi %21, %20 : vector<8x8xi32>
      %23 = tpu.iota {dimensions = array<i32: 1>} : vector<8x8xi32>
      %24 = vector.broadcast %4 : i32 to vector<8x8xi32>
      %25 = arith.addi %24, %23 : vector<8x8xi32>
      %26 = arith.cmpi sle, %25, %22 : vector<8x8xi32>
      %cst_14 = arith.constant -1.000000e+30 : f32
      %27 = vector.broadcast %cst_14 : f32 to vector<8x8xf32>
      %28 = arith.select %26, %19, %27 : vector<8x8xi1>, vector<8x8xf32>
      %c0_15 = arith.constant 0 : index
      %c0_16 = arith.constant 0 : index
      %29 = vector.load %arg7[%c0_15, %c0_16] : memref<8x1xf32, #tpu.memory_space<vmem>>, vector<8x1xf32>
      %cst_17 = arith.constant dense<0xFF800000> : vector<8xf32>
      %30 = vector.multi_reduction <maximumf>, %28, %cst_17 [1] : vector<8x8xf32> to vector<8xf32>
      %31 = vector.shape_cast %30 : vector<8xf32> to vector<8x1xf32>
      %32 = arith.maximumf %29, %31 : vector<8x1xf32>
      %33 = arith.subf %29, %32 : vector<8x1xf32>
      %34 = math.exp %33 : vector<8x1xf32>
      %35 = vector.broadcast %32 : vector<8x1xf32> to vector<8x8xf32>
      %36 = arith.subf %28, %35 : vector<8x8xf32>
      %37 = math.exp %36 : vector<8x8xf32>
      %c0_18 = arith.constant 0 : index
      %c0_19 = arith.constant 0 : index
      %38 = vector.load %arg8[%c0_18, %c0_19] : memref<8x1xf32, #tpu.memory_space<vmem>>, vector<8x1xf32>
      %39 = arith.mulf %34, %38 : vector<8x1xf32>
      %cst_20 = arith.constant dense<0.000000e+00> : vector<8xf32>
      %40 = vector.multi_reduction <add>, %37, %cst_20 [1] : vector<8x8xf32> to vector<8xf32>
      %41 = vector.shape_cast %40 : vector<8xf32> to vector<8x1xf32>
      %42 = arith.addf %39, %41 : vector<8x1xf32>
      %c0_21 = arith.constant 0 : index
      %c0_22 = arith.constant 0 : index
      %43 = vector.load %arg8[%c0_21, %c0_22] : memref<8x1xf32, #tpu.memory_space<vmem>>, vector<8x1xf32>
      tpu.vector_store %arg8[%c0_21, %c0_22], %42 {strides = array<i32>} : memref<8x1xf32, #tpu.memory_space<vmem>>, vector<8x1xf32>,
      %c0_23 = arith.constant 0 : index
      %c0_24 = arith.constant 0 : index
      %44 = vector.load %arg9[%c0_23, %c0_24] : memref<8x8xf32, #tpu.memory_space<vmem>>, vector<8x8xf32>
      %45 = vector.broadcast %34 : vector<8x1xf32> to vector<8x8xf32>
      %46 = arith.mulf %45, %44 : vector<8x8xf32>
      %cst_25 = arith.constant dense<0.000000e+00> : vector<8x8xf32>
      %47 = tpu.matmul %37, %18, %cst_25 {dimension_numbers = #tpu.dot_dimension_numbers<[1], [0], [0], [1], [0, 0, 1, 1], [], []>} : vector<8x8xf32>, vector<8x8xf32>, vector<8x8xf32> -> vector<8x8xf32>
      %48 = arith.addf %46, %47 : vector<8x8xf32>
      %c0_26 = arith.constant 0 : index
      %c0_27 = arith.constant 0 : index
      %49 = vector.load %arg9[%c0_26, %c0_27] : memref<8x8xf32, #tpu.memory_space<vmem>>, vector<8x8xf32>
      tpu.vector_store %arg9[%c0_26, %c0_27], %48 {strides = array<i32>} : memref<8x8xf32, #tpu.memory_space<vmem>>, vector<8x8xf32>,
      %c0_28 = arith.constant 0 : index
      %c0_29 = arith.constant 0 : index
      %50 = vector.load %arg7[%c0_28, %c0_29] : memref<8x1xf32, #tpu.memory_space<vmem>>, vector<8x1xf32>
      tpu.vector_store %arg7[%c0_28, %c0_29], %32 {strides = array<i32>} : memref<8x1xf32, #tpu.memory_space<vmem>>, vector<8x1xf32>,
    } else {
    }
    %c0_i32_4 = arith.constant 0 : i32
    %10 = arith.cmpi eq, %arg2, %c0_i32_4 : i32
    %11 = arith.extui %10 : i1 to i32
    %c0_i32_5 = arith.constant 0 : i32
    %12 = arith.cmpi ne, %11, %c0_i32_5 : i32
    scf.if %12 {
      %c0 = arith.constant 0 : index
      %c0_6 = arith.constant 0 : index
      %13 = vector.load %arg9[%c0, %c0_6] : memref<8x8xf32, #tpu.memory_space<vmem>>, vector<8x8xf32>
      %c0_7 = arith.constant 0 : index
      %c0_8 = arith.constant 0 : index
      %14 = vector.load %arg8[%c0_7, %c0_8] : memref<8x1xf32, #tpu.memory_space<vmem>>, vector<8x1xf32>
      %15 = tpu.reciprocal %14 : vector<8x1xf32> -> vector<8x1xf32>
      %16 = vector.broadcast %15 : vector<8x1xf32> to vector<8x8xf32>
      %17 = arith.mulf %13, %16 : vector<8x8xf32>
      %c0_9 = arith.constant 0 : index
      %c0_10 = arith.constant 0 : index
      %c0_11 = arith.constant 0 : index
      %18 = vector.load %arg6[%c0_9, %c0_10, %c0_11] : memref<1x8x8xf32, #tpu.memory_space<vmem>>, vector<1x8x8xf32>
      %19 = vector.shape_cast %18 : vector<1x8x8xf32> to vector<8x8xf32>
      %20 = vector.shape_cast %17 : vector<8x8xf32> to vector<1x8x8xf32>
      tpu.vector_store %arg6[%c0_9, %c0_10, %c0_11], %20 {strides = array<i32>} : memref<1x8x8xf32, #tpu.memory_space<vmem>>, vector<1x8x8xf32>,
    } else {
    }
    return
  }
  func.func @transform_0(%arg0: i32, %arg1: i32, %arg2: i32) -> (i32, i32, i32) {
    %c0_i32 = arith.constant 0 : i32
    %c0_i32_0 = arith.constant 0 : i32
    return %arg0, %arg1, %c0_i32 : i32, i32, i32
  }
  func.func @transform_1(%arg0: i32, %arg1: i32, %arg2: i32) -> (i32, i32, i32) {
    %c0_i32 = arith.constant 0 : i32
    %c0_i32_0 = arith.constant 0 : i32
    return %arg0, %arg2, %c0_i32 : i32, i32, i32
  }
  func.func @transform_2(%arg0: i32, %arg1: i32, %arg2: i32) -> (i32, i32, i32) {
    %c0_i32 = arith.constant 0 : i32
    %c0_i32_0 = arith.constant 0 : i32
    return %arg0, %arg2, %c0_i32 : i32, i32, i32
  }
  func.func @transform_3(%arg0: i32, %arg1: i32, %arg2: i32) -> (i32, i32, i32) {
    %c0_i32 = arith.constant 0 : i32
    %c0_i32_0 = arith.constant 0 : i32
    return %arg0, %arg1, %c0_i32 : i32, i32, i32
  }
}

module attributes {stable_mosaic.version = 11 : i64} {
  func.func @_outproj_ffn_kernel(%arg0: i32, %arg1: memref<16x32xf32, #tpu.memory_space<vmem>>, %arg2: memref<16x32xf32, #tpu.memory_space<vmem>>, %arg3: memref<32x32xf32, #tpu.memory_space<vmem>>, %arg4: memref<1x32xf32, #tpu.memory_space<vmem>>, %arg5: memref<1x32xf32, #tpu.memory_space<vmem>>, %arg6: memref<1x32xf32, #tpu.memory_space<vmem>>, %arg7: memref<32x64xf32, #tpu.memory_space<vmem>>, %arg8: memref<1x64xf32, #tpu.memory_space<vmem>>, %arg9: memref<64x32xf32, #tpu.memory_space<vmem>>, %arg10: memref<1x32xf32, #tpu.memory_space<vmem>>, %arg11: memref<16x32xf32, #tpu.memory_space<vmem>>) attributes {dimension_semantics = [#tpu.dimension_semantics<parallel>], iteration_bounds = array<i64: 1>, scalar_prefetch = 0 : i64, scratch_operands = 0 : i64, tpu.core_type = #tpu.core_type<tc>, window_params = [{transform_indices = @transform_0, window_bounds = array<i64: 16, 32>}, {transform_indices = @transform_1, window_bounds = array<i64: 16, 32>}, {pipeline_mode = #tpu.pipeline_mode<synchronous>, transform_indices = @transform_2, window_bounds = array<i64: 32, 32>}, {pipeline_mode = #tpu.pipeline_mode<synchronous>, transform_indices = @transform_3, window_bounds = array<i64: 1, 32>}, {pipeline_mode = #tpu.pipeline_mode<synchronous>, transform_indices = @transform_4, window_bounds = array<i64: 1, 32>}, {pipeline_mode = #tpu.pipeline_mode<synchronous>, transform_indices = @transform_5, window_bounds = array<i64: 1, 32>}, {pipeline_mode = #tpu.pipeline_mode<synchronous>, transform_indices = @transform_6, window_bounds = array<i64: 32, 64>}, {pipeline_mode = #tpu.pipeline_mode<synchronous>, transform_indices = @transform_7, window_bounds = array<i64: 1, 64>}, {pipeline_mode = #tpu.pipeline_mode<synchronous>, transform_indices = @transform_8, window_bounds = array<i64: 64, 32>}, {pipeline_mode = #tpu.pipeline_mode<synchronous>, transform_indices = @transform_9, window_bounds = array<i64: 1, 32>}, {transform_indices = @transform_10, window_bounds = array<i64: 16, 32>}]} {
    %c0 = arith.constant 0 : index
    %c0_0 = arith.constant 0 : index
    %0 = vector.load %arg1[%c0, %c0_0] : memref<16x32xf32, #tpu.memory_space<vmem>>, vector<16x32xf32>
    %c0_1 = arith.constant 0 : index
    %c0_2 = arith.constant 0 : index
    %1 = vector.load %arg3[%c0_1, %c0_2] : memref<32x32xf32, #tpu.memory_space<vmem>>, vector<32x32xf32>
    %cst = arith.constant dense<0.000000e+00> : vector<16x32xf32>
    %2 = tpu.matmul %0, %1, %cst {dimension_numbers = #tpu.dot_dimension_numbers<[1], [0], [0], [1], [0, 0, 1, 1], [], []>} : vector<16x32xf32>, vector<32x32xf32>, vector<16x32xf32> -> vector<16x32xf32>
    %c0_3 = arith.constant 0 : index
    %c0_4 = arith.constant 0 : index
    %3 = vector.load %arg4[%c0_3, %c0_4] : memref<1x32xf32, #tpu.memory_space<vmem>>, vector<1x32xf32>
    %4 = vector.broadcast %3 : vector<1x32xf32> to vector<16x32xf32>
    %5 = arith.addf %2, %4 : vector<16x32xf32>
    %c0_5 = arith.constant 0 : index
    %c0_6 = arith.constant 0 : index
    %6 = vector.load %arg2[%c0_5, %c0_6] : memref<16x32xf32, #tpu.memory_space<vmem>>, vector<16x32xf32>
    %7 = arith.addf %6, %5 : vector<16x32xf32>
    %cst_7 = arith.constant dense<0.000000e+00> : vector<16xf32>
    %8 = vector.multi_reduction <add>, %7, %cst_7 [1] : vector<16x32xf32> to vector<16xf32>
    %9 = vector.shape_cast %8 : vector<16xf32> to vector<16x1xf32>
    %cst_8 = arith.constant 3.200000e+01 : f32
    %10 = vector.broadcast %cst_8 : f32 to vector<16x1xf32>
    %11 = arith.divf %9, %10 : vector<16x1xf32>
    %12 = vector.broadcast %11 : vector<16x1xf32> to vector<16x32xf32>
    %13 = arith.subf %7, %12 : vector<16x32xf32>
    %14 = arith.mulf %13, %13 : vector<16x32xf32>
    %cst_9 = arith.constant dense<0.000000e+00> : vector<16xf32>
    %15 = vector.multi_reduction <add>, %14, %cst_9 [1] : vector<16x32xf32> to vector<16xf32>
    %16 = vector.shape_cast %15 : vector<16xf32> to vector<16x1xf32>
    %cst_10 = arith.constant 3.200000e+01 : f32
    %17 = vector.broadcast %cst_10 : f32 to vector<16x1xf32>
    %18 = arith.divf %16, %17 : vector<16x1xf32>
    %cst_11 = arith.constant 9.99999974E-6 : f32
    %19 = vector.broadcast %cst_11 : f32 to vector<16x1xf32>
    %20 = arith.addf %18, %19 : vector<16x1xf32>
    %21 = math.rsqrt %20 : vector<16x1xf32>
    %22 = vector.broadcast %21 : vector<16x1xf32> to vector<16x32xf32>
    %23 = arith.mulf %13, %22 : vector<16x32xf32>
    %c0_12 = arith.constant 0 : index
    %c0_13 = arith.constant 0 : index
    %24 = vector.load %arg5[%c0_12, %c0_13] : memref<1x32xf32, #tpu.memory_space<vmem>>, vector<1x32xf32>
    %25 = vector.broadcast %24 : vector<1x32xf32> to vector<16x32xf32>
    %26 = arith.mulf %23, %25 : vector<16x32xf32>
    %c0_14 = arith.constant 0 : index
    %c0_15 = arith.constant 0 : index
    %27 = vector.load %arg6[%c0_14, %c0_15] : memref<1x32xf32, #tpu.memory_space<vmem>>, vector<1x32xf32>
    %28 = vector.broadcast %27 : vector<1x32xf32> to vector<16x32xf32>
    %29 = arith.addf %26, %28 : vector<16x32xf32>
    %c0_16 = arith.constant 0 : index
    %c0_17 = arith.constant 0 : index
    %30 = vector.load %arg7[%c0_16, %c0_17] : memref<32x64xf32, #tpu.memory_space<vmem>>, vector<32x64xf32>
    %cst_18 = arith.constant dense<0.000000e+00> : vector<16x64xf32>
    %31 = tpu.matmul %29, %30, %cst_18 {dimension_numbers = #tpu.dot_dimension_numbers<[1], [0], [0], [1], [0, 0, 1, 1], [], []>} : vector<16x32xf32>, vector<32x64xf32>, vector<16x64xf32> -> vector<16x64xf32>
    %c0_19 = arith.constant 0 : index
    %c0_20 = arith.constant 0 : index
    %32 = vector.load %arg8[%c0_19, %c0_20] : memref<1x64xf32, #tpu.memory_space<vmem>>, vector<1x64xf32>
    %33 = vector.broadcast %32 : vector<1x64xf32> to vector<16x64xf32>
    %34 = arith.addf %31, %33 : vector<16x64xf32>
    %cst_21 = arith.constant 0.000000e+00 : f32
    %35 = vector.broadcast %cst_21 : f32 to vector<16x64xf32>
    %36 = arith.maximumf %34, %35 : vector<16x64xf32>
    %c0_22 = arith.constant 0 : index
    %c0_23 = arith.constant 0 : index
    %37 = vector.load %arg9[%c0_22, %c0_23] : memref<64x32xf32, #tpu.memory_space<vmem>>, vector<64x32xf32>
    %cst_24 = arith.constant dense<0.000000e+00> : vector<16x32xf32>
    %38 = tpu.matmul %36, %37, %cst_24 {dimension_numbers = #tpu.dot_dimension_numbers<[1], [0], [0], [1], [0, 0, 1, 1], [], []>} : vector<16x64xf32>, vector<64x32xf32>, vector<16x32xf32> -> vector<16x32xf32>
    %c0_25 = arith.constant 0 : index
    %c0_26 = arith.constant 0 : index
    %39 = vector.load %arg10[%c0_25, %c0_26] : memref<1x32xf32, #tpu.memory_space<vmem>>, vector<1x32xf32>
    %40 = vector.broadcast %39 : vector<1x32xf32> to vector<16x32xf32>
    %41 = arith.addf %38, %40 : vector<16x32xf32>
    %42 = arith.addf %7, %41 : vector<16x32xf32>
    %c0_27 = arith.constant 0 : index
    %c0_28 = arith.constant 0 : index
    %43 = vector.load %arg11[%c0_27, %c0_28] : memref<16x32xf32, #tpu.memory_space<vmem>>, vector<16x32xf32>
    tpu.vector_store %arg11[%c0_27, %c0_28], %42 {strides = array<i32>} : memref<16x32xf32, #tpu.memory_space<vmem>>, vector<16x32xf32>,
    return
  }
  func.func @transform_0(%arg0: i32) -> (i32, i32) {
    %c0_i32 = arith.constant 0 : i32
    %c0_i32_0 = arith.constant 0 : i32
    return %arg0, %c0_i32 : i32, i32
  }
  func.func @transform_1(%arg0: i32) -> (i32, i32) {
    %c0_i32 = arith.constant 0 : i32
    %c0_i32_0 = arith.constant 0 : i32
    return %arg0, %c0_i32 : i32, i32
  }
  func.func @transform_2(%arg0: i32) -> (i32, i32) {
    %c0_i32 = arith.constant 0 : i32
    %c0_i32_0 = arith.constant 0 : i32
    %c0_i32_1 = arith.constant 0 : i32
    return %c0_i32, %c0_i32_0 : i32, i32
  }
  func.func @transform_3(%arg0: i32) -> (i32, i32) {
    %c0_i32 = arith.constant 0 : i32
    %c0_i32_0 = arith.constant 0 : i32
    %c0_i32_1 = arith.constant 0 : i32
    return %c0_i32, %c0_i32_0 : i32, i32
  }
  func.func @transform_4(%arg0: i32) -> (i32, i32) {
    %c0_i32 = arith.constant 0 : i32
    %c0_i32_0 = arith.constant 0 : i32
    %c0_i32_1 = arith.constant 0 : i32
    return %c0_i32, %c0_i32_0 : i32, i32
  }
  func.func @transform_5(%arg0: i32) -> (i32, i32) {
    %c0_i32 = arith.constant 0 : i32
    %c0_i32_0 = arith.constant 0 : i32
    %c0_i32_1 = arith.constant 0 : i32
    return %c0_i32, %c0_i32_0 : i32, i32
  }
  func.func @transform_6(%arg0: i32) -> (i32, i32) {
    %c0_i32 = arith.constant 0 : i32
    %c0_i32_0 = arith.constant 0 : i32
    %c0_i32_1 = arith.constant 0 : i32
    return %c0_i32, %c0_i32_0 : i32, i32
  }
  func.func @transform_7(%arg0: i32) -> (i32, i32) {
    %c0_i32 = arith.constant 0 : i32
    %c0_i32_0 = arith.constant 0 : i32
    %c0_i32_1 = arith.constant 0 : i32
    return %c0_i32, %c0_i32_0 : i32, i32
  }
  func.func @transform_8(%arg0: i32) -> (i32, i32) {
    %c0_i32 = arith.constant 0 : i32
    %c0_i32_0 = arith.constant 0 : i32
    %c0_i32_1 = arith.constant 0 : i32
    return %c0_i32, %c0_i32_0 : i32, i32
  }
  func.func @transform_9(%arg0: i32) -> (i32, i32) {
    %c0_i32 = arith.constant 0 : i32
    %c0_i32_0 = arith.constant 0 : i32
    %c0_i32_1 = arith.constant 0 : i32
    return %c0_i32, %c0_i32_0 : i32, i32
  }
  func.func @transform_10(%arg0: i32) -> (i32, i32) {
    %c0_i32 = arith.constant 0 : i32
    %c0_i32_0 = arith.constant 0 : i32
    return %arg0, %c0_i32 : i32, i32
  }
}

</mosaic_0001>

<bundles_post_ra>
// kernel: decoder_layer_forward.3
= control target key start
LH: loop header
LB: loop body
LE: loop exit
PB: predicated region body
PF: predicated region fallthrough
CT: control target
= control target key end

     0   :  { %15 = vsyncpa [#allocation3], 0  ;;  %s542_s0 = inlined_call_operand.vmem [shape: f32[16,32], index: 0, kind: input, shape index: {}]   ;;  %s543_s1 = inlined_call_operand.hbm [shape: f32[16,32], index: 1, kind: input, shape index: {}]   ;;  %s544_s2 = inlined_call_operand.vmem [shape: f32[1,32], index: 2, kind: input, shape index: {}]   ;;  %s545_s3 = inlined_call_operand.vmem [shape: f32[1,32], index: 3, kind: input, shape index: {}]   ;;  %s546_s4 = inlined_call_operand.hbm [shape: f32[32,64], index: 4, kind: input, shape index: {}]   ;;  %s547_s5 = inlined_call_operand.vmem [shape: f32[1,64], index: 5, kind: input, shape index: {}]   ;;  %s548_s6 = inlined_call_operand.hbm [shape: f32[32,32], index: 6, kind: input, shape index: {}]   ;;  %s549_s7 = inlined_call_operand.vmem [shape: f32[1,32], index: 7, kind: input, shape index: {}]   ;;  %s550_s8 = inlined_call_operand.vmem [shape: f32[16,64], index: 8, kind: output, shape index: {0}]   ;;  %s551_s9 = inlined_call_operand.vmem [shape: f32[16,32], index: 9, kind: output, shape index: {1}]  }
   0x1   :  { %16 = vsyncpa [#allocation5], 0  ;;  %s438_s30 = smov [#allocation4]   ;;  %s439_s11 = smov [#allocation2]  }
   0x2   :  { %s40_s10 = sshll.u32 %s438_s30, 4  ;;  %s24_s12 = sshll.u32 %s439_s11, 4  ;;  %s41_s10 = int_to_ptr.vmem [resolvable:$true] %s40_s10  ;;  %s25_s12 = int_to_ptr.vmem [resolvable:$true] %s24_s12 }
   0x3   :  { %s382_s13 = scalar_lea.vmem %s41_s10, 512  ;;  %p387_p1 = scmp.lt.s32.totalorder %s41_s10, %s41_s10 }
   0x4   :  { %p383_p0 = scmp.ne.s32.totalorder %s41_s10, %s382_s13  ;;  %p388_p2 = scmp.lt.s32.totalorder %s382_s13, %s382_s13 }
   0x6   :  { %p389_p3 = por %p388_p2, %p387_p1 }
   0x8   :  { %p390_p4 = pnand %p389_p3, %p383_p0 }
   0xa   :  { %393 = shalt.err (!%p390_p4)
}
   0xb   :  { %s440_s14 = smov 128   ;;  %s441_s15 = smov 8  }
   0xc   :  { %46 = dma.hbm_to_vmem [thread:$0]  %s546_s4, 512, %s41_s10, [#allocation5], %s440_s14, %s440_s14, %s441_s15  }
   0xd   :  { %s402_s18 = scalar_lea.vmem %s25_s12, 256  ;;  %p407_p6 = scmp.lt.s32.totalorder %s25_s12, %s25_s12 }
   0xe   :  { %p403_p5 = scmp.ne.s32.totalorder %s25_s12, %s402_s18  ;;  %p408_p7 = scmp.lt.s32.totalorder %s402_s18, %s402_s18 }
  0x10   :  { %p409_p8 = por %p408_p7, %p407_p6 }
  0x12   :  { %p410_p9 = pnand %p409_p8, %p403_p5 }
  0x14   :  { %413 = shalt.err (!%p410_p9)
}
  0x15   :  { %30 = dma.hbm_to_vmem [thread:$0]  %s543_s1, 256, %s25_s12, [#allocation3], %s440_s14, %s440_s14, %s441_s15  }
  0x16   :  { %s442_s21 = smov [#allocation6]  }
  0x17   :  { %s54_s22 = sshll.u32 %s442_s21, 4  ;;  %s55_s22 = int_to_ptr.vmem [resolvable:$true] %s54_s22 }
  0x18   :  { %s422_s23 = scalar_lea.vmem %s55_s22, 512  ;;  %p427_p11 = scmp.lt.s32.totalorder %s55_s22, %s55_s22 }
  0x19   :  { %p423_p10 = scmp.ne.s32.totalorder %s55_s22, %s422_s23  ;;  %p428_p12 = scmp.lt.s32.totalorder %s422_s23, %s422_s23 }
  0x1b   :  { %p429_p13 = por %p428_p12, %p427_p11 }
  0x1d   :  { %p430_p0 = pnand %p429_p13, %p423_p10 }
  0x1f   :  { %433 = shalt.err (!%p430_p0)
}
  0x20   :  { %60 = dma.hbm_to_vmem [thread:$0]  %s548_s6, 512, %s55_s22, [#allocation5], %s440_s14, %s440_s14, %s441_s15  }
  0x21   :  { %434 = dma.done.wait [#allocation3], 256  }
  0x22   :  { %435 = vsyncadd [#allocation3], 4294967040 }
  0x23   :  { %436 = dma.done.wait [#allocation5], 1024  }
  0x24   :  { %437 = vsyncadd [#allocation5], 4294966272  ;;  %vm74_vm0 = vcmask 261120   ;;  %v72_v0 = vld [vmem:[%s542_s0] sm:$0xff]  ;;  %v73_v1 = vld [vmem:[%s542_s0 + $0x8] sm:$0xff]  ;;  %vm308_vm1 = vcmask 523264  }
  0x25   :  { %v75_v2 = vsel %vm74_vm0, %v72_v0, 0.0  ;;  %v78_v3 = vsel %vm74_vm0, %v73_v1, 0.0  ;;  %v219_v14 = vld [vmem:[#allocation6 + $0x18] sm:$0xff]  ;;  %v218_v16 = vld [vmem:[#allocation6 + $0x10] sm:$0xff]  ;;  %v217_v18 = vld [vmem:[#allocation6 + $0x8] sm:$0xff] }
  0x26   :  { %76 = vadd.xlane.f32.xlu0 %v75_v2  ;;  %v127_v15 = vld [vmem:[#allocation4 + $0x18] sm:$0xff]  ;;  %354 = vmatprep.subr.mxu1 %v219_v14  ;;  %v126_v17 = vld [vmem:[#allocation4 + $0x10] sm:$0xff]  ;;  %v125_v19 = vld [vmem:[#allocation4 + $0x8] sm:$0xff] }
  0x27   :  { %343 = vmatprep.subr.mxu0 %v127_v15  ;;  %355 = vmatpush3.msra.mxu1 %v219_v14  ;;  %v216_v20 = vld [vmem:[#allocation6] sm:$0xff]  ;;  %v323_v29 = vld [vmem:[%s544_s2] ss:$0 sm:$0xff]  ;;  %v121_v39 = vld [vmem:[#allocation2 + $0x8] sm:$0xff] }
  0x28   :  { %344 = vmatpush3.msra.mxu0 %v127_v15  ;;  %356 = vmatprep.subr.mxu1 %v218_v16  ;;  %v124_v21 = vld [vmem:[#allocation4] sm:$0xff]  ;;  %v324_v31 = vld [vmem:[%s545_s3] ss:$0 sm:$0xff] }
  0x29   :  { %345 = vmatprep.subr.mxu0 %v126_v17  ;;  %357 = vmatpush3.msra.mxu1 %v218_v16  ;;  %v120_v34 = vld [vmem:[#allocation2] sm:$0xff] }
  0x2a   :  { %79 = vadd.xlane.f32.xlu0 %v78_v3  ;;  %346 = vmatpush3.msra.mxu0 %v126_v17  ;;  %v328_v42 = vld [vmem:[%s549_s7] ss:$0 sm:$0xff] }
  0x2b   :  { %358 = vmatprep.subr.mxu1 %v217_v18  ;;  %347 = vmatprep.subr.mxu0 %v125_v19  ;;  %v325_v44 = vld [vmem:[%s547_s5] ss:$0 sm:$0xff] }
  0x2c   :  { %359 = vmatpush3.msra.mxu1 %v217_v18  ;;  %348 = vmatpush3.msra.mxu0 %v125_v19 }
  0x2d   :  { %360 = vmatprep.subr.mxu1 %v216_v20  ;;  %349 = vmatprep.subr.mxu0 %v124_v21 }
  0x2e   :  { %361 = vmatpush3.msra.mxu1 %v216_v20  ;;  %350 = vmatpush3.msra.mxu0 %v124_v21 }
  0xaf   :  { %v77_v4 = vpop.xlane.xlu0 %76 }
  0xb0   :  { %v82_v5 = vmul.f32 0.03125, %v77_v4 }
  0xb2   :  { %v84_v6 = vsub.f32 %v72_v0, %v82_v5 }
  0xb3   :  { %v80_v7 = vpop.xlane.xlu0 %79 }
  0xb4   :  { %v83_v8 = vmul.f32 0.03125, %v80_v7  ;;  %v86_v9 = vmul.f32 %v84_v6, %v84_v6 }
  0xb6   :  { %v85_v10 = vsub.f32 %v73_v1, %v83_v8  ;;  %v88_v11 = vsel %vm74_vm0, %v86_v9, 0.0 }
  0xb7   :  { %89 = vadd.xlane.f32.xlu1 %v88_v11 }
  0xb8   :  { %v87_v12 = vmul.f32 %v85_v10, %v85_v10 }
  0xba   :  { %v91_v13 = vsel %vm74_vm0, %v87_v12, 0.0 }
  0xbb   :  { %92 = vadd.xlane.f32.xlu1 %v91_v13 }
 0x140   :  { %v90_v22 = vpop.xlane.xlu1 %89 }
 0x141   :  { %v94_v23 = vmul.f32 0.03125, %v90_v22 }
 0x143   :  { %v96_v24 = vadd.f32 1e-05, %v94_v23 }
 0x144   :  { %v93_v25 = vpop.xlane.xlu1 %92 }
 0x145   :  { %370 = vrsqrt.f32 %v96_v24  ;;  %v95_v26 = vmul.f32 0.03125, %v93_v25 }
 0x147   :  { %v97_v27 = vadd.f32 1e-05, %v95_v26 }
 0x149   :  { %372 = vrsqrt.f32 %v97_v27 }
 0x152   :  { %v371_v28 = vpop.eup %370 }
 0x153   :  { %v100_v30 = vmul.f32 %v371_v28, %v84_v6 }
 0x155   :  { %v109_v32 = vmul.f32 %v323_v29, %v100_v30 }
 0x156   :  { %v373_v33 = vpop.eup %372 }
 0x157   :  { %v101_v35 = vmul.f32 %v373_v33, %v85_v10  ;;  %v118_v36 = vadd.f32 %v324_v31, %v109_v32 }
 0x159   :  { %v110_v37 = vmul.f32 %v323_v29, %v101_v35  ;;  %362 = vmatprep.mubr.msk.f32.mxu1 %vm74_vm0, %v118_v36  ;;  %v122_v38 = vadd.f32 %v120_v34, %v118_v36 }
 0x15b   :  { %v119_v40 = vadd.f32 %v324_v31, %v110_v37  ;;  %351 = vmatprep.mubr.msk.f32.mxu0 %vm74_vm0, %v122_v38 }
 0x15d   :  { %v123_v41 = vadd.f32 %v121_v39, %v119_v40  ;;  %363 = vmatmul.mubr.msk.f32.vlgmr.msra.gmra.mxu1 %vm74_vm0, %v119_v40 }
 0x15f   :  { %352 = vmatmul.mubr.msk.f32.vlgmr.msra.gmra.mxu0 %vm74_vm0, %v123_v41 }
 0x21d   :  { %v364_v43 = vpop.f32.mrf.mxu1 }
 0x21e   :  { %v305_v45 = vadd.f32 %v364_v43, %v328_v42 }
 0x21f   :  { %v353_v46 = vpop.f32.mrf.mxu0  ;;  %v299_v47 = vpop.f32.mrf.mxu1 }
 0x220   :  { %312 = vst.msk [vmem:[%s551_s9 + $0x8] sm:$0xff] %vm74_vm0, %v305_v45  ;;  %v213_v48 = vadd.f32 %v353_v46, %v325_v44  ;;  %v300_v49 = vadd.f32 %v328_v42, %v299_v47 }
 0x221   :  { %v207_v50 = vpop.f32.mrf.mxu0 }
 0x222   :  { %310 = vst.msk [vmem:[%s550_s8 + $0x8] sm:$0xff] %vm308_vm1, %v213_v48  ;;  %v208_v51 = vadd.f32 %v325_v44, %v207_v50 }
 0x223   :  { %311 = vst.msk [vmem:[%s551_s9] sm:$0xff] %vm74_vm0, %v300_v49 }
 0x224   :  { %309 = vst.msk [vmem:[%s550_s8] sm:$0xff] %vm308_vm1, %v208_v51 }
 0x225   :  { %321 = vsyncpa [#allocation3], 1 }
 0x226   :  { %322 = vsyncpa [#allocation5], 1 }

// kernel: decoder_layer_forward.4
= control target key start
LH: loop header
LB: loop body
LE: loop exit
PB: predicated region body
PF: predicated region fallthrough
CT: control target
= control target key end

     0   :  { %s706_s12 = smov 0   ;;  %s708_s13 = smov 0   ;;  %s763_s0 = inlined_call_operand.vmem [shape: f32[8,8,8], index: 0, kind: input, shape index: {}]   ;;  %s764_s1 = inlined_call_operand.vmem [shape: f32[8,8,8], index: 1, kind: input, shape index: {}]   ;;  %s765_s2 = inlined_call_operand.vmem [shape: f32[8,8,8], index: 2, kind: input, shape index: {}]   ;;  %s766_s3 = inlined_call_operand.vmem [shape: f32[8,8,8], index: 3, kind: output, shape index: {}]  }
   0x1   :  { %s710_s14 = smov 0  }
   0x2 LB: > { %s32_s15 = sadd.s32 1, %s676_s13  ;;  %p598_p0 = scmp.ge.s32.totalorder %s680_s14, 1  ;;  %s680_s14 = sphi %s710_s14, %s13_s14   ;;  %s676_s13 = sphi %s708_s13, %s768_s13   ;;  %s672_s12 = sphi %s706_s12, %s767_s12  }
   0x3   : > { %p34_p1 = scmp.ge.s32.totalorder %s32_s15, 8  ;;  %p190_p2 = scmp.lt.s32.totalorder %s680_s14, 9 }
   0x5   : > { %s770_s15 = smov (%p34_p1, %s32_s15), 0  ;;  %p191_p3 = pnand %p598_p0, %p190_p2 }
   0x6   : > { %p232_p4 = scmp.lt.s32.totalorder (!%p191_p3), %s672_s12, 7 }
   0x7   : > { %194 = sbr.rel (%p191_p3) target bundleno = 786 (0x312), region = 32 }
   0xc   : > { %vm267_vm0 = vcmask 64512   ;;  %v682_v0 = vmov 0.0   ;;  %vm683_vm1 = vmmov 0   ;;  %s772_s12 = smov (!%p232_p4, %s672_s12), 7  ;;  %vm264_vm2 = vcmask 7168  }
   0xd   : > { %612 = vmatprep.subr.mxu0 %v682_v0  ;;  %268 = vst.msk [vmem:[#allocation4] sm:$0xff] %vm267_vm0, %v682_v0  ;;  %614 = vmatprep.mubr.msk.f32.mxu0 %vm683_vm1, %v682_v0  ;;  %s725_s16 = sshll.u32 %s772_s12, 3  ;;  %v684_v3 = vmov -1e+30   ;;  %v356_v4 = vlaneseq  ;;  %v685_v11 = vmov 0  }
   0xe   : > { %617 = vmatprep.subr.mxu1 %v682_v0  ;;  %619 = vmatprep.mubr.msk.f32.mxu1 %vm683_vm1, %v682_v0  ;;  %s245_s19 = scalar_lea.vmem %s764_s1, %s725_s16  ;;  %s238_s22 = scalar_lea.vmem %s763_s0, %s725_s16  ;;  %265 = vst.msk [vmem:[#allocation2] sm:$0xff] %vm264_vm2, %v684_v3  ;;  %266 = vst.msk [vmem:[#allocation3] sm:$0xff] %vm264_vm2, %v682_v0 }
   0xf   : > { %v277_v1 = vld [vmem:[%s245_s19] sm:$0xff]  ;;  %v357_v5 = vshrl.u32 %v356_v4, 7  ;;  %v361_v6 = vand.u32 127, %v356_v4  ;;  %650 = vset.pattern.permute.xlu0 %v685_v11  ;;  %651 = vset.pattern.permute.xlu1 %v685_v11  ;;  %s252_s25 = scalar_lea.vmem %s765_s2, %s725_s16  ;;  %s259_s28 = scalar_lea.vmem %s766_s3, %s725_s16 }
  0x10   : > { %613 = vmatpush3.xpose.msk.msra.mxu0 %vm267_vm0, %v277_v1  ;;  %v276_v2 = vld [vmem:[%s238_s22] sm:$0xff] }
  0x11   : > { %vm364_vm3 = vcmp.le.s32.totalorder %v361_v6, %v357_v5  ;;  %v278_v16 = vld [vmem:[%s252_s25] sm:$0xff] }
  0x12   : > { %618 = vmatpush3.msra.mxu1 %v278_v16 }
  0x13   : > { %615 = vmatmul.mubr.msk.f32.vlgmr.msra.gmra.mxu0 %vm267_vm0, %v276_v2 }
  0x14   : > { %v390_v30 = vld [vmem:[#allocation4] sm:$0xff] }
  0x15   : > { %v366_v12 = vld [vmem:[#allocation2] sm:$0xff]  ;;  %v382_v24 = vld [vmem:[#allocation3] sm:$0xff] }
  0xd3   : > { %v352_v7 = vpop.f32.mrf.mxu0 }
  0xd4   : > { %v365_v8 = vsel %vm364_vm3, %v352_v7, -1e+30 }
  0xd5   : > { %v616_v9 = vpop.f32.mrf.mxu0  ;;  %v367_v10 = vsel %vm267_vm0, %v365_v8, -inf }
  0xd6   : > { %368 = vmax.xlane.f32.xlu0 %v367_v10 }
 0x15f   : > { %v369_v13 = vpop.xlane.xlu0 %368 }
 0x160   : > { %v370_v14 = vmax.f32 %v366_v12, %v369_v13 }
 0x162   : > { %v371_v15 = vsub.f32 %v366_v12, %v370_v14  ;;  %472 = vst.msk [vmem:[#allocation2] sm:$0xff] %vm264_vm2, %v370_v14  ;;  %376 = vperm.xlu0 %650, %v370_v14  }
 0x164   : > { %v372_v21 = vmul.f32 1.442695, %v371_v15 }
 0x1dd   : > { %v377_v17 = vpop.permute.xlu0 %376 }
 0x1de   : > { %v379_v18 = vsub.f32 %v365_v8, %v377_v17 }
 0x1e0   : > { %v380_v19 = vmul.f32 1.442695, %v379_v18 }
 0x1e2   : > { %652 = vpow2.f32 %v380_v19 }
 0x1e3   : > { %654 = vpow2.f32 %v372_v21 }
 0x1ef   : > { %v653_v20 = vpop.eup %652 }
 0x1f0   : > { %620 = vmatmul.mubr.msk.f32.vlgmr.msra.gmra.mxu1 %vm267_vm0, %v653_v20  ;;  %v384_v22 = vsel %vm267_vm0, %v653_v20, 0.0  ;;  %v655_v23 = vpop.eup %654 }
 0x1f1   : > { %385 = vadd.xlane.f32.xlu1 %v384_v22  ;;  %v383_v25 = vmul.f32 %v655_v23, %v382_v24 }
 0x202   : > { %393 = vperm.xlu1 %651, %v655_v23  }
 0x27a   : > { %v386_v26 = vpop.xlane.xlu1 %385 }
 0x27b   : > { %v387_v27 = vadd.f32 %v386_v26, %v383_v25 }
 0x27d   : > { %389 = vst.msk [vmem:[#allocation3] sm:$0xff] %vm264_vm2, %v387_v27 }
 0x27e   : > { %v394_v31 = vpop.permute.xlu1 %393 }
 0x27f   : > { %v396_v32 = vmul.f32 %v394_v31, %v390_v30 }
 0x284   : > { %v477_v28 = vld [vmem:[#allocation3] sm:$0xff] }
 0x285   : > { %656 = vrcp.f32 %v477_v28 }
 0x292   : > { %v657_v29 = vpop.eup %656 }
 0x293   : > { %481 = vperm.xlu1 %651, %v657_v29  }
 0x2b0   : > { %v466_v33 = vpop.f32.mrf.mxu1 }
 0x2b1   : > { %v470_v34 = vadd.f32 %v466_v33, %v396_v32 }
 0x2b2   : > { %v621_v35 = vpop.f32.mrf.mxu1 }
 0x2b3   : > { %471 = vst.msk [vmem:[#allocation4] sm:$0xff] %vm267_vm0, %v470_v34 }
 0x2ba   : > { %v476_v36 = vld [vmem:[#allocation4] sm:$0xff] }
 0x30e   : > { %v482_v37 = vpop.permute.xlu1 %481 }
 0x30f   : > { %v484_v38 = vmul.f32 %v482_v37, %v476_v36 }
 0x311   : > { %486 = vst.msk [vmem:[%s259_s28] sm:$0xff] %vm267_vm0, %v484_v38 }
 0x312 PF: > { %s13_s14 = sadd.s32 1, %s680_s14   ;;  %s767_s12 = smov %s676_s13 }
 0x313   : > { %p10_p5 = scmp.ge.s32.totalorder %s13_s14, 10   ;;  %s768_s13 = smov %s770_s15 }
 0x315   :  { %12 = sbr.rel (!%p10_p5) target bundleno = 2 (0x2), region = 80 }

// kernel: decoder_layer_forward.5
= control target key start
LH: loop header
LB: loop body
LE: loop exit
PB: predicated region body
PF: predicated region fallthrough
CT: control target
= control target key end

     0   :  { %vm49_vm0 = vcmask 261120   ;;  %s650_s0 = inlined_call_operand.vmem [shape: f32[16,32], index: 0, kind: input, shape index: {}]   ;;  %s651_s1 = inlined_call_operand.vmem [shape: f32[16,32], index: 1, kind: input, shape index: {}]   ;;  %s652_s2 = inlined_call_operand.vmem [shape: f32[32,32], index: 2, kind: input, shape index: {}]   ;;  %s653_s3 = inlined_call_operand.vmem [shape: f32[1,32], index: 3, kind: input, shape index: {}]   ;;  %s654_s4 = inlined_call_operand.vmem [shape: f32[1,32], index: 4, kind: input, shape index: {}]   ;;  %s655_s5 = inlined_call_operand.vmem [shape: f32[1,32], index: 5, kind: input, shape index: {}]   ;;  %s656_s6 = inlined_call_operand.vmem [shape: f32[32,64], index: 6, kind: input, shape index: {}]   ;;  %s657_s7 = inlined_call_operand.vmem [shape: f32[1,64], index: 7, kind: input, shape index: {}]   ;;  %s658_s8 = inlined_call_operand.vmem [shape: f32[64,32], index: 8, kind: input, shape index: {}]   ;;  %s659_s9 = inlined_call_operand.vmem [shape: f32[1,32], index: 9, kind: input, shape index: {}]   ;;  %s660_s10 = inlined_call_operand.hbm [shape: f32[16,32], index: 10, kind: output, shape index: {}]  }
   0x1   :  { %v41_v0 = vld [vmem:[%s652_s2 + $0x18] sm:$0xff]  ;;  %v40_v1 = vld [vmem:[%s652_s2 + $0x10] sm:$0xff]  ;;  %v36_v2 = vld [vmem:[%s650_s0] sm:$0xff] }
   0x2   :  { %424 = vmatprep.subr.mxu1 %v41_v0  ;;  %v39_v3 = vld [vmem:[%s652_s2 + $0x8] sm:$0xff]  ;;  %432 = vmatprep.mubr.msk.f32.mxu1 %vm49_vm0, %v36_v2 }
   0x3   :  { %425 = vmatpush3.msra.mxu1 %v41_v0 }
   0x4   :  { %15 = vsyncpa [#allocation3], 0  ;;  %426 = vmatprep.subr.mxu1 %v40_v1  ;;  %v38_v4 = vld [vmem:[%s652_s2] sm:$0xff]  ;;  %v37_v5 = vld [vmem:[%s650_s0 + $0x8] sm:$0xff]  ;;  %vm289_vm1 = vcmask 523264  }
   0x5   :  { %427 = vmatpush3.msra.mxu1 %v40_v1  ;;  %v391_v7 = vld [vmem:[%s653_s3] ss:$0 sm:$0xff]  ;;  %v132_v12 = vld [vmem:[%s651_s1 + $0x8] sm:$0xff]  ;;  %v183_v27 = vld [vmem:[%s656_s6 + $0x18] sm:$0xff] }
   0x6   :  { %428 = vmatprep.subr.mxu1 %v39_v3  ;;  %v131_v9 = vld [vmem:[%s651_s1] sm:$0xff]  ;;  %v182_v28 = vld [vmem:[%s656_s6 + $0x10] sm:$0xff]  ;;  %v181_v29 = vld [vmem:[%s656_s6 + $0x8] sm:$0xff] }
   0x7   :  { %429 = vmatpush3.msra.mxu1 %v39_v3  ;;  %v180_v30 = vld [vmem:[%s656_s6] sm:$0xff]  ;;  %v281_v31 = vld [vmem:[%s658_s8 + $0x38] sm:$0xff]  ;;  %v280_v32 = vld [vmem:[%s658_s8 + $0x30] sm:$0xff] }
   0x8   :  { %430 = vmatprep.subr.mxu1 %v38_v4  ;;  %446 = vmatprep.subr.mxu0 %v281_v31  ;;  %v279_v33 = vld [vmem:[%s658_s8 + $0x28] sm:$0xff]  ;;  %v278_v34 = vld [vmem:[%s658_s8 + $0x20] sm:$0xff]  ;;  %v277_v51 = vld [vmem:[%s658_s8 + $0x18] sm:$0xff] }
   0x9   :  { %431 = vmatpush3.msra.mxu1 %v38_v4  ;;  %447 = vmatpush3.msra.mxu0 %v281_v31  ;;  %v394_v42 = vld [vmem:[%s654_s4] ss:$0 sm:$0xff]  ;;  %v276_v52 = vld [vmem:[%s658_s8 + $0x10] sm:$0xff]  ;;  %v275_v53 = vld [vmem:[%s658_s8 + $0x8] sm:$0xff] }
   0xa   :  { %433 = vmatmul.mubr.msk.f32.vlgmr.msra.gmra.mxu1 %vm49_vm0, %v37_v5  ;;  %435 = vmatprep.subr.mxu1 %v183_v27  ;;  %v395_v44 = vld [vmem:[%s655_s5] ss:$0 sm:$0xff] }
   0xb   :  { %436 = vmatpush3.msra.mxu1 %v183_v27  ;;  %448 = vmatprep.subr.mxu0 %v280_v32  ;;  %v274_v54 = vld [vmem:[%s658_s8] sm:$0xff]  ;;  %s494_s8 = smov [#allocation2]  }
   0xc   :  { %437 = vmatprep.subr.mxu1 %v182_v28  ;;  %449 = vmatpush3.msra.mxu0 %v280_v32  ;;  %v396_v55 = vld [vmem:[%s657_s7] ss:$0 sm:$0xff]  ;;  %s380_s12 = sshll.u32 %s494_s8, 4  ;;  %s381_s12 = int_to_ptr.vmem [resolvable:$true] %s380_s12 }
   0xd   :  { %438 = vmatpush3.msra.mxu1 %v182_v28  ;;  %450 = vmatprep.subr.mxu0 %v279_v33  ;;  %v399_v62 = vld [vmem:[%s659_s9] ss:$0 sm:$0xff]  ;;  %s472_s7 = scalar_lea.vmem %s381_s12, 256  ;;  %p477_p1 = scmp.lt.s32.totalorder %s381_s12, %s381_s12 }
   0xe   :  { %439 = vmatprep.subr.mxu1 %v181_v29  ;;  %451 = vmatpush3.msra.mxu0 %v279_v33  ;;  %p473_p0 = scmp.ne.s32.totalorder %s381_s12, %s472_s7  ;;  %p478_p2 = scmp.lt.s32.totalorder %s472_s7, %s472_s7 }
   0xf   :  { %440 = vmatpush3.msra.mxu1 %v181_v29  ;;  %452 = vmatprep.subr.mxu0 %v278_v34 }
  0x10   :  { %441 = vmatprep.subr.mxu1 %v180_v30  ;;  %453 = vmatpush3.msra.mxu0 %v278_v34  ;;  %p479_p3 = por %p478_p2, %p477_p1 }
  0x11   :  { %442 = vmatpush3.msra.mxu1 %v180_v30  ;;  %454 = vmatprep.subr.mxu0 %v277_v51 }
  0x12   :  { %455 = vmatpush3.msra.mxu0 %v277_v51  ;;  %p480_p4 = pnand %p479_p3, %p473_p0 }
  0x13   :  { %456 = vmatprep.subr.mxu0 %v276_v52 }
  0x14   :  { %457 = vmatpush3.msra.mxu0 %v276_v52 }
  0x15   :  { %458 = vmatprep.subr.mxu0 %v275_v53 }
  0x16   :  { %459 = vmatpush3.msra.mxu0 %v275_v53 }
  0x17   :  { %460 = vmatprep.subr.mxu0 %v274_v54 }
  0x18   :  { %461 = vmatpush3.msra.mxu0 %v274_v54 }
  0xca   :  { %v434_v6 = vpop.f32.mrf.mxu1 }
  0xcb   :  { %v128_v10 = vadd.f32 %v434_v6, %v391_v7 }
  0xcc   :  { %v122_v8 = vpop.f32.mrf.mxu1 }
  0xcd   :  { %v123_v11 = vadd.f32 %v391_v7, %v122_v8  ;;  %v583_v14 = vadd.f32 %v132_v12, %v128_v10 }
  0xcf   :  { %v581_v13 = vadd.f32 %v131_v9, %v123_v11  ;;  %v138_v16 = vsel %vm49_vm0, %v583_v14, 0.0 }
  0xd1   :  { %v135_v15 = vsel %vm49_vm0, %v581_v13, 0.0 }
  0xd2   :  { %136 = vadd.xlane.f32.xlu0 %v135_v15 }
  0xd6   :  { %139 = vadd.xlane.f32.xlu0 %v138_v16 }
 0x15b   :  { %v137_v17 = vpop.xlane.xlu0 %136 }
 0x15c   :  { %v142_v18 = vmul.f32 0.03125, %v137_v17 }
 0x15e   :  { %v144_v19 = vsub.f32 %v581_v13, %v142_v18 }
 0x15f   :  { %v140_v20 = vpop.xlane.xlu0 %139 }
 0x160   :  { %v143_v21 = vmul.f32 0.03125, %v140_v20  ;;  %v146_v22 = vmul.f32 %v144_v19, %v144_v19 }
 0x162   :  { %v145_v23 = vsub.f32 %v583_v14, %v143_v21  ;;  %v148_v24 = vsel %vm49_vm0, %v146_v22, 0.0 }
 0x163   :  { %149 = vadd.xlane.f32.xlu1 %v148_v24 }
 0x164   :  { %v147_v25 = vmul.f32 %v145_v23, %v145_v23 }
 0x166   :  { %v151_v26 = vsel %vm49_vm0, %v147_v25, 0.0 }
 0x167   :  { %152 = vadd.xlane.f32.xlu1 %v151_v26 }
 0x1ec   :  { %v150_v35 = vpop.xlane.xlu1 %149 }
 0x1ed   :  { %v154_v36 = vmul.f32 0.03125, %v150_v35 }
 0x1ef   :  { %v156_v37 = vadd.f32 1e-05, %v154_v36 }
 0x1f0   :  { %v153_v38 = vpop.xlane.xlu1 %152 }
 0x1f1   :  { %468 = vrsqrt.f32 %v156_v37  ;;  %v155_v39 = vmul.f32 0.03125, %v153_v38 }
 0x1f3   :  { %v157_v40 = vadd.f32 1e-05, %v155_v39 }
 0x1f5   :  { %470 = vrsqrt.f32 %v157_v40 }
 0x1fe   :  { %v469_v41 = vpop.eup %468 }
 0x1ff   :  { %v160_v43 = vmul.f32 %v469_v41, %v144_v19 }
 0x201   :  { %v169_v45 = vmul.f32 %v394_v42, %v160_v43 }
 0x202   :  { %v471_v46 = vpop.eup %470 }
 0x203   :  { %v161_v47 = vmul.f32 %v471_v46, %v145_v23  ;;  %v178_v48 = vadd.f32 %v395_v44, %v169_v45 }
 0x205   :  { %v170_v49 = vmul.f32 %v394_v42, %v161_v47  ;;  %443 = vmatprep.mubr.msk.f32.mxu1 %vm49_vm0, %v178_v48 }
 0x207   :  { %v179_v50 = vadd.f32 %v395_v44, %v170_v49 }
 0x209   :  { %444 = vmatmul.mubr.msk.f32.vlgmr.msra.gmra.mxu1 %vm49_vm0, %v179_v50 }
 0x2c9   :  { %v445_v56 = vpop.f32.mrf.mxu1 }
 0x2ca   :  { %v269_v57 = vadd.f32 %v445_v56, %v396_v55 }
 0x2cb   :  { %v263_v58 = vpop.f32.mrf.mxu1 }
 0x2cc   :  { %v264_v59 = vadd.f32 %v396_v55, %v263_v58  ;;  %v273_v61 = vmax.f32 %v269_v57, 0.0 }
 0x2ce   :  { %v272_v60 = vmax.f32 %v264_v59, 0.0 }
 0x2d0   :  { %462 = vmatprep.mubr.msk.f32.mxu0 %vm289_vm1, %v272_v60 }
 0x2d1   :  { %463 = vmatmul.mubr.msk.f32.vlgmr.msra.gmra.mxu0 %vm289_vm1, %v273_v61 }
 0x391   :  { %v464_v63 = vpop.f32.mrf.mxu0 }
 0x392   :  { %v368_v0 = vadd.f32 %v464_v63, %v399_v62 }
 0x393   :  { %v362_v1 = vpop.f32.mrf.mxu0 }
 0x394   :  { %v372_v2 = vadd.f32 %v368_v0, %v583_v14  ;;  %v363_v3 = vadd.f32 %v399_v62, %v362_v1 }
 0x396   :  { %374 = vst.msk [vmem:[#allocation2 + $0x8] sm:$0xff] %vm49_vm0, %v372_v2  ;;  %v371_v4 = vadd.f32 %v363_v3, %v581_v13 }
 0x398   :  { %373 = vst.msk [vmem:[#allocation2] sm:$0xff] %vm49_vm0, %v371_v4 }
 0x399   :  { %483 = shalt.err (!%p480_p4)
}
 0x39a   :  { %s495_s9 = smov 128   ;;  %s496_s13 = smov 8  }
 0x39b   :  { %386 = dma.vmem_to_hbm [thread:$0]  %s381_s12, 256, %s660_s10, [#allocation3], %s495_s9, %s495_s9, %s496_s13  }
 0x39c   :  { %492 = dma.done.wait [#allocation3], 256  }
 0x39d   :  { %493 = vsyncadd [#allocation3], 4294967040 }
 0x39e   :  { %390 = vsyncpa [#allocation3], 1 }

</bundles_post_ra>
